<compile_context>
chip_gen: v6e
topology: v6e:2x2x1
jax: 0.10.0
libtpu: 0.0.40
codegen_flags: <defaults>
</compile_context>

<pallas_src>
import functools

import jax
import jax.numpy as jnp
from jax import lax
from jax.experimental import pallas as pl
from jax.experimental.pallas import tpu as pltpu

_LANE = 128
_SUB = 8

# ---------------------------------------------------------------------------
# One-time trace-time probe of pltpu.roll's direction (expected: jnp.roll
# semantics, element i -> i+shift).  Makes the packed-gate lane shifts robust.
_ROLL_SIGN = None


def _roll_sign():
    global _ROLL_SIGN
    if _ROLL_SIGN is None:
        def k(x_ref, o_ref):
            o_ref[...] = pltpu.roll(x_ref[...], shift=1, axis=1)

        x = jnp.broadcast_to(jnp.arange(_LANE, dtype=jnp.float32)[None, :],
                             (_SUB, _LANE))
        y = pl.pallas_call(
            k, out_shape=jax.ShapeDtypeStruct((_SUB, _LANE), jnp.float32))(x)
        _ROLL_SIGN = 1 if int(y[0, 1]) == 0 else -1
    return _ROLL_SIGN


def _vmem_budget_bytes():
    """~3/4 of physical VMEM (v5e/v6e 128 MiB, v7x 64 MiB), with fallback."""
    try:
        cap = int(pltpu.get_tpu_info().vmem_capacity_bytes)
    except Exception:
        cap = 64 * 1024 * 1024
    cap = max(32 * 1024 * 1024, min(cap, 128 * 1024 * 1024))
    return (cap * 3) // 4


def _urnn_kernel(x_ref, w_ih_ref, b_ih_ref, w_hh_ref, b_hh_ref,
                 w_fc_ref, b_fc_ref, out_ref,
                 gi_ref, h_ref, h_carry_ref,
                 *, sh_r_to_n, sh_z_to_0, sh_n_to_0, mxu_dtype):
    # x_ref:   (Tc*Bg, D)   time-major, one padded-batch group
    # w_ih:    (D, GW)      BN + b_hh(r,z) already folded   b_ih: (1, GW)
    # w_hh:    (Hs, GW)     rows >= H are zero              b_hh: (1, GW) (n only)
    # w_fc:    (Hs, Fp)     rows >= H are zero              b_fc: (1, Fp)
    # out_ref: (Tc*Bg, Fp)
    # gi_ref:  (Tc*Bg, GW) scratch    h_ref: (Tc*Bg, Hs) scratch
    # h_carry_ref: (Bg, Hs) scratch, persists across time chunks
    rows, GW = gi_ref.shape
    Bg, Hs = h_carry_ref.shape
    Tc = rows // Bg

    # New batch group starts -> reset the hidden-state carry.  Keyed off the
    # TIME-axis program id (axis 1), not axis 0, so the batch-parallel axis is
    # safe.
    @pl.when(pl.program_id(1) == 0)
    def _():
        h_carry_ref[...] = jnp.zeros_like(h_carry_ref)

    # Phase 1: batched input projection for the whole chunk, gates packed into
    # GW lanes (BN and the r/z recurrent biases are already folded in).
    gi_ref[...] = (jnp.dot(x_ref[...], w_ih_ref[...],
                           preferred_element_type=jnp.float32)
                   + b_ih_ref[...])

    # Loop-invariant hoists (JAX does not CSE broadcast_in_dim across iters).
    w_hh = w_hh_ref[...]                                   # (Hs, GW)
    b_hh = jnp.broadcast_to(b_hh_ref[...], (Bg, GW))       # n-gate bias only

    # Phase 2: serial GRU recurrence (PyTorch gate order r, z, n).  Hidden
    # state lives in lanes [0:H] of an Hs-wide vreg; lanes >= H carry bounded
    # junk that is killed by the zero rows of w_hh / w_fc.
    def step(t, h):
        off = pl.multiple_of(t * Bg, Bg)                   # sublane-aligned
        gi_t = gi_ref[pl.ds(off, Bg), :]                   # (Bg, GW)
        gh = (jnp.dot(h.astype(mxu_dtype), w_hh,
                      preferred_element_type=jnp.float32) + b_hh)
        a = jax.nn.sigmoid(gi_t + gh)                      # r, z in their lanes
        a_rn = pltpu.roll(a, shift=sh_r_to_n, axis=1)      # r aligned w/ n lanes
        nf = jnp.tanh(gi_t + a_rn * gh)                    # n in its lanes
        z0 = pltpu.roll(a, shift=sh_z_to_0, axis=1)[:, :Hs]
        n0 = pltpu.roll(nf, shift=sh_n_to_0, axis=1)[:, :Hs]
        h_new = (1.0 - z0) * n0 + z0 * h                   # valid in lanes [0:H]
        h_ref[pl.ds(off, Bg), :] = h_new
        return h_new

    h_last = lax.fori_loop(0, Tc, step, h_carry_ref[...], unroll=8)
    h_carry_ref[...] = h_last

    # Phase 3: batched 1x1-conv (FC) + sigmoid; one lane-dense store.
    # Dropout(p) in eval mode is identity.
    logits = (jnp.dot(h_ref[...].astype(mxu_dtype), w_fc_ref[...],
                      preferred_element_type=jnp.float32)
              + b_fc_ref[...])
    out_ref[...] = jax.nn.sigmoid(logits).astype(out_ref.dtype)


def urnn_forward(x, params, *, t_chunk=None, batch_groups=None,
                 mxu_dtype=jnp.float32, eps=1e-5):
    """x: (B, T, F, 2) float32 -> (B, T, F) float32 (sigmoid probabilities)."""
    B, T, F, C = x.shape
    assert C == 2
    D = 2 * F
    H = params["w_hh"].shape[0]
    F_out = params["w_fc"].shape[1]
    f32 = jnp.float32

    GW = pl.cdiv(3 * H, _LANE) * _LANE      # packed gate width (3H<=128 -> 128)
    Hs = pl.cdiv(H, _LANE) * _LANE          # hidden-state lane width
    Fp = pl.cdiv(F_out, _LANE) * _LANE      # lane-dense output width
    Bp = pl.cdiv(B, _SUB) * _SUB            # batch padded to sublane tile

    # Split the padded batch into groups for the v7x 2-TC "parallel" axis
    # (harmless on 1-TC chips: it just serializes).
    if batch_groups is None:
        batch_groups = 2 if Bp >= 2 * _SUB else 1
    G = max(1, min(int(batch_groups), Bp // _SUB))
    while Bp % G:
        G -= 1
    Bg = Bp // G

    # ---- Fold eval-mode BatchNorm2d into the GRU input projection ----------
    # Channel pattern [c0, c1] repeated F times matches torch.reshape of
    # (B,T,F,2) -> (B,T,2F):  x_norm @ W = x @ (scale*W) + shift @ W.
    inv = 1.0 / jnp.sqrt(params["bn_var"].astype(f32) + eps)              # (2,)
    scale_c = params["bn_gamma"].astype(f32) * inv
    shift_c = params["bn_beta"].astype(f32) - params["bn_mean"].astype(f32) * scale_c
    scale = jnp.tile(scale_c, F)                                          # (D,)
    shift = jnp.tile(shift_c, F)
    w_ih0 = params["w_ih"].astype(f32)                                    # (D, 3H)
    w_ih = w_ih0 * scale[:, None]
    b_ih = params["b_ih"].astype(f32)[0] + shift @ w_ih0                  # (3H,)

    # Fold b_hh for the r/z gates into b_ih; b_hn must stay inside r*(...) to
    # match PyTorch's GRU, so it remains as the (n-lanes-only) recurrent bias.
    b_hh = params["b_hh"].astype(f32)[0]                                  # (3H,)
    b_ih = b_ih + jnp.concatenate([b_hh[:2 * H], jnp.zeros((H,), f32)])
    b_hh_n = jnp.concatenate([jnp.zeros((2 * H,), f32), b_hh[2 * H:]])

    # ---- Packed / zero-padded parameter blocks ------------------------------
    pad_g = GW - 3 * H
    w_ih_p = jnp.pad(w_ih, ((0, 0), (0, pad_g))).astype(mxu_dtype)        # (D, GW)
    b_ih_p = jnp.pad(b_ih, ((0, pad_g),))[None, :]                        # (1, GW)
    w_hh_p = jnp.pad(params["w_hh"].astype(f32),
                     ((0, Hs - H), (0, pad_g))).astype(mxu_dtype)         # (Hs, GW)
    b_hh_p = jnp.pad(b_hh_n, ((0, pad_g),))[None, :]                      # (1, GW)
    w_fc_p = jnp.pad(params["w_fc"].astype(f32),
                     ((0, Hs - H), (0, Fp - F_out))).astype(mxu_dtype)    # (Hs, Fp)
    b_fc_p = jnp.pad(params["b_fc"].astype(f32),
                     ((0, 0), (0, Fp - F_out)))                           # (1, Fp)

    # ---- Input layout: (G, T, Bg, D) flattened to a lane-friendly 2-D slab --
    x_tbd = jnp.transpose(x.reshape(B, T, D).astype(f32), (1, 0, 2))      # (T, B, D)
    x_pad = jnp.zeros((T, Bp, D), f32).at[:, :B, :].set(x_tbd)
    x_flat = (jnp.transpose(x_pad.reshape(T, G, Bg, D), (1, 0, 2, 3))
              .reshape(G * T * Bg, D).astype(mxu_dtype))

    # ---- Time-chunk sizing from a per-generation VMEM budget ----------------
    budget = _vmem_budget_bytes()
    w_bytes = sum(int(a.size) * a.dtype.itemsize
                  for a in (w_ih_p, b_ih_p, w_hh_p, b_hh_p, w_fc_p, b_fc_p))
    itm = jnp.dtype(mxu_dtype).itemsize
    per_step = Bg * (2 * D * itm + 2 * Fp * 4 + GW * 4 + Hs * 4)
    fixed = 2 * w_bytes + Bg * Hs * 4 + (1 << 20)
    if t_chunk is None:
        t_chunk = max(1, min(T, int((budget - fixed) // per_step)))
        while T % t_chunk:
            t_chunk -= 1
    Tc = int(t_chunk)
    assert T % Tc == 0
    nt = T // Tc
    rows_c = Tc * Bg

    # Lane shifts for the packed-gate extraction (direction-checked once).
    sgn = _roll_sign()
    sh_r_to_n = (sgn * 2 * H) % GW          # align r with the n lanes
    sh_z_to_0 = (sgn * (GW - H)) % GW       # bring z to lane offset 0
    sh_n_to_0 = (sgn * (GW - 2 * H)) % GW   # bring n to lane offset 0

    kernel = functools.partial(
        _urnn_kernel, sh_r_to_n=sh_r_to_n, sh_z_to_0=sh_z_to_0,
        sh_n_to_0=sh_n_to_0, mxu_dtype=mxu_dtype)

    flops = 2 * T * Bp * (D * GW + Hs * GW + Hs * Fp)
    transcendentals = T * Bp * (2 * GW + Fp)
    bytes_accessed = int(x_flat.size) * itm + G * T * Bg * Fp * 4 + G * nt * w_bytes

    out_flat = pl.pallas_call(
        kernel,
        out_shape=jax.ShapeDtypeStruct((G * T * Bg, Fp), f32),
        grid_spec=pltpu.PrefetchScalarGridSpec(
            num_scalar_prefetch=0,
            grid=(G, nt),
            in_specs=[
                pl.BlockSpec((rows_c, D), lambda g, t: (g * nt + t, 0)),
                pl.BlockSpec(w_ih_p.shape, lambda g, t: (0, 0)),
                pl.BlockSpec(b_ih_p.shape, lambda g, t: (0, 0)),
                pl.BlockSpec(w_hh_p.shape, lambda g, t: (0, 0)),
                pl.BlockSpec(b_hh_p.shape, lambda g, t: (0, 0)),
                pl.BlockSpec(w_fc_p.shape, lambda g, t: (0, 0)),
                pl.BlockSpec(b_fc_p.shape, lambda g, t: (0, 0)),
            ],
            out_specs=pl.BlockSpec((rows_c, Fp), lambda g, t: (g * nt + t, 0)),
            scratch_shapes=[
                pltpu.VMEM((rows_c, GW), f32),   # gi: packed input projections
                pltpu.VMEM((rows_c, Hs), f32),   # per-step hidden states
                pltpu.VMEM((Bg, Hs), f32),       # hidden-state carry
            ]),
        compiler_params=pltpu.CompilerParams(
            dimension_semantics=("parallel", "arbitrary"),
            vmem_limit_bytes=int(budget)),
        cost_estimate=pl.CostEstimate(
            flops=int(flops), transcendentals=int(transcendentals),
            bytes_accessed=int(bytes_accessed)),
    )(x_flat, w_ih_p, b_ih_p, w_hh_p, b_hh_p, w_fc_p, b_fc_p)

    out = (out_flat.reshape(G, T, Bg, Fp)
           .transpose(1, 0, 2, 3).reshape(T, Bp, Fp)[:, :B, :F_out])      # (T,B,F)
    return jnp.transpose(out, (1, 0, 2))                                  # (B,T,F)


def ref_forward(x, params, eps=1e-5):
    """Pure-JAX reference matching the PyTorch module (eval mode)."""
    B, T, F, _ = x.shape
    H = params["w_hh"].shape[0]
    xn = (x - params["bn_mean"]) / jnp.sqrt(params["bn_var"] + eps) \
        * params["bn_gamma"] + params["bn_beta"]
    xr = xn.reshape(B, T, 2 * F)

    def step(h, xt):
        gi = xt @ params["w_ih"] + params["b_ih"][0]
        gh = h @ params["w_hh"] + params["b_hh"][0]
        r = jax.nn.sigmoid(gi[:, :H] + gh[:, :H])
        z = jax.nn.sigmoid(gi[:, H:2 * H] + gh[:, H:2 * H])
        n = jnp.tanh(gi[:, 2 * H:] + r * gh[:, 2 * H:])
        h = (1.0 - z) * n + z * h
        return h, h

    h0 = jnp.zeros((B, H), jnp.float32)
    _, hs = lax.scan(step, h0, jnp.transpose(xr, (1, 0, 2)))     # (T, B, H)
    logits = jnp.einsum("tbh,hf->tbf", hs, params["w_fc"]) + params["b_fc"][0]
    return jax.nn.sigmoid(jnp.transpose(logits, (1, 0, 2)))      # (B, T, F)


if __name__ == "__main__":
    # Small shapes consistent with the module: frame_size=32 -> F = 17, D = 34.
    frame_size = 32
    F = frame_size // 2 + 1       # 17
    H = 32                        # hidden_size
    D = 2 * F

    key = jax.random.PRNGKey(0)
    ks = jax.random.split(key, 12)
    params = dict(
        w_ih=jax.random.normal(ks[0], (D, 3 * H), jnp.float32) * 0.1,
        b_ih=jax.random.normal(ks[1], (1, 3 * H), jnp.float32) * 0.1,
        w_hh=jax.random.normal(ks[2], (H, 3 * H), jnp.float32) * 0.1,
        b_hh=jax.random.normal(ks[3], (1, 3 * H), jnp.float32) * 0.1,
        w_fc=jax.random.normal(ks[4], (H, F), jnp.float32) * 0.1,
        b_fc=jax.random.normal(ks[5], (1, F), jnp.float32) * 0.1,
        bn_gamma=jax.random.uniform(ks[6], (2,), jnp.float32, 0.5, 1.5),
        bn_beta=jax.random.normal(ks[7], (2,), jnp.float32) * 0.1,
        bn_mean=jax.random.normal(ks[8], (2,), jnp.float32) * 0.1,
        bn_var=jax.random.uniform(ks[9], (2,), jnp.float32, 0.5, 1.5),
    )

    # 1) f32 path, tight tolerance against the pure-JAX reference.
    B, T = 2, 16
    x = jax.random.normal(ks[10], (B, T, F, 2), jnp.float32)
    out = jax.block_until_ready(urnn_forward(x, params))
    ref = ref_forward(x, params)
    assert out.shape == (B, T, F), out.shape
    assert bool(jnp.all(jnp.isfinite(out)))
    err = float(jnp.max(jnp.abs(out - ref)))
    assert jnp.allclose(out, ref, atol=2e-4, rtol=2e-4), err

    # 2) Multi time-chunk + batch-group ("parallel") grid axis: exercises the
    #    hidden-state carry across chunks and the per-group carry reset.
    B2, T2 = 10, 8
    x2 = jax.random.normal(ks[11], (B2, T2, F, 2), jnp.float32)
    out2 = jax.block_until_ready(
        urnn_forward(x2, params, t_chunk=4, batch_groups=2))
    ref2 = ref_forward(x2, params)
    assert out2.shape == (B2, T2, F), out2.shape
    err2 = float(jnp.max(jnp.abs(out2 - ref2)))
    assert jnp.allclose(out2, ref2, atol=2e-4, rtol=2e-4), err2

    # 3) bf16 MXU-operand fast path (v6e/v7x); loose tolerance.
    out_bf16 = jax.block_until_ready(
        urnn_forward(x, params, mxu_dtype=jnp.bfloat16))
    assert out_bf16.shape == (B, T, F)
    assert bool(jnp.all(jnp.isfinite(out_bf16)))
    err_bf16 = float(jnp.max(jnp.abs(out_bf16 - ref)))
    assert err_bf16 < 5e-2, err_bf16

    print("KERNEL_OK")
</pallas_src>

<mosaic_0001>
module attributes {stable_mosaic.version = 11 : i64} {
  func.func @k(%arg0: memref<8x128xf32, #tpu.memory_space<vmem>>, %arg1: memref<8x128xf32, #tpu.memory_space<vmem>>) attributes {dimension_semantics = [], scalar_prefetch = 0 : i64, scratch_operands = 0 : i64, tpu.core_type = #tpu.core_type<tc>} {
    %c0 = arith.constant 0 : index
    %c0_0 = arith.constant 0 : index
    %0 = vector.load %arg0[%c0, %c0_0] : memref<8x128xf32, #tpu.memory_space<vmem>>, vector<8x128xf32>
    %c1_i32 = arith.constant 1 : i32
    %1 = tpu.dynamic_rotate %0 by %c1_i32 dim 1 : vector<8x128xf32>, i32 -> vector<8x128xf32>
    %c0_1 = arith.constant 0 : index
    %c0_2 = arith.constant 0 : index
    %2 = vector.load %arg1[%c0_1, %c0_2] : memref<8x128xf32, #tpu.memory_space<vmem>>, vector<8x128xf32>
    tpu.vector_store %arg1[%c0_1, %c0_2], %1 {strides = array<i32>} : memref<8x128xf32, #tpu.memory_space<vmem>>, vector<8x128xf32>,
    return
  }
}

</mosaic_0001>

<bundles_post_ra>
// kernel: tpu_custom_call.1
= control target key start
LH: loop header
LB: loop body
LE: loop exit
PB: predicated region body
PF: predicated region fallthrough
CT: control target
= control target key end

     0   :  { %6 = vsyncpa [#allocation3], 0  ;;  %s106_s0 = inlined_call_operand.hbm [shape: f32[8,128], index: 0, kind: input, shape index: {}]   ;;  %s107_s1 = inlined_call_operand.hbm [shape: f32[8,128], index: 1, kind: output, shape index: {}]  }
   0x1   :  { %7 = vsyncpa [#allocation4], 0  ;;  %s87_s6 = smov [#allocation2]  }
   0x2   :  { %s14_s7 = sshll.u32 %s87_s6, 4  ;;  %s15_s7 = int_to_ptr.vmem [resolvable:$true] %s14_s7 }
   0x3   :  { %s51_s8 = scalar_lea.vmem %s15_s7, 128  ;;  %p56_p1 = scmp.lt.s32.totalorder %s15_s7, %s15_s7 }
   0x4   :  { %p52_p0 = scmp.ne.s32.totalorder %s15_s7, %s51_s8  ;;  %p57_p2 = scmp.lt.s32.totalorder %s51_s8, %s51_s8 }
   0x6   :  { %p58_p3 = por %p57_p2, %p56_p1 }
   0x8   :  { %p59_p4 = pnand %p58_p3, %p52_p0 }
   0xa   :  { %62 = shalt.err (!%p59_p4)
}
   0xb   :  { %17 = dma.hbm_to_vmem [thread:$0]  %s106_s0, 128, %s15_s7, [#allocation3]  }
   0xc   :  { %83 = dma.done.wait [#allocation3], 128  }
   0xd   :  { %84 = vsyncadd [#allocation3], 4294967168  ;;  %v21_v0 = vld [vmem:[#allocation2] sm:$0xff]  ;;  %s88_s11 = smov 1   ;;  %s89_s12 = smov [#allocation5]  }
   0xe   :  { %22 = vrot.lane.b32.xlu0 %v21_v0, %s88_s11  ;;  %s31_s13 = sshll.u32 %s89_s12, 4  ;;  %s32_s13 = int_to_ptr.vmem [resolvable:$true] %s31_s13 }
   0xf   :  { %s63_s14 = scalar_lea.vmem %s32_s13, 128  ;;  %p68_p6 = scmp.lt.s32.totalorder %s32_s13, %s32_s13 }
  0x10   :  { %p64_p5 = scmp.ne.s32.totalorder %s32_s13, %s63_s14  ;;  %p69_p7 = scmp.lt.s32.totalorder %s63_s14, %s63_s14 }
  0x12   :  { %p70_p8 = por %p69_p7, %p68_p6 }
  0x14   :  { %p71_p9 = pnand %p70_p8, %p64_p5 }
  0x80   :  { %v23_v1 = vpop.permute.xlu0 %22 }
  0x81   :  { %24 = vst [vmem:[#allocation5] sm:$0xff] %v23_v1 }
  0x82   :  { %74 = shalt.err (!%p71_p9)
}
  0x83   :  { %34 = dma.vmem_to_hbm [thread:$0]  %s32_s13, 128, %s107_s1, [#allocation4]  }
  0x84   :  { %85 = dma.done.wait [#allocation4], 128  }
  0x85   :  { %86 = vsyncadd [#allocation4], 4294967168 }
  0x86   :  { %38 = vsyncpa [#allocation3], 1 }
  0x87   :  { %39 = vsyncpa [#allocation4], 1 }

</bundles_post_ra>
